<compile_context>
chip_gen: v7x
topology: tpu7x:2x2x1
jax: 0.10.0
libtpu: 0.0.40
codegen_flags: <defaults>
</compile_context>

<pallas_src>
import functools

import jax
import jax.numpy as jnp
from jax.experimental import pallas as pl
from jax.experimental.pallas import tpu as pltpu


def irony_kernel(x_ref, w13_ref, vec_ref, w4p_ref, out_ref, *,
                 batch, seq, e2, hdim, e2pad):
    x = x_ref[...]                                                    # (B*S, E)

    # One fused MXU matmul for both x-consuming projections:
    #   columns [0, e2)          -> attention Linear(E, E//2)
    #   columns [e2pad, e2pad+H) -> network   Linear(E, H)   (vreg-aligned slice)
    x13 = jnp.dot(x, w13_ref[...], preferred_element_type=jnp.float32)  # (B*S, e2pad+H)

    # Packed 1-row operands: row 0 = b1, row 1 = w2 (row vec), row 2 = b3, row 3 = b4 (padded).
    b1 = vec_ref[0:1, :e2]                                            # (1, E//2)
    w2r = vec_ref[1:2, :e2]                                           # (1, E//2)
    b3 = vec_ref[2:3, :hdim]                                          # (1, H)
    b4p = vec_ref[3:4, :]                                             # (1, Cpad)

    # --- AttentionLayer: tanh(x @ w1 + b1) @ w2  (out_features == 1 -> VPU reduce) ---
    a1 = jnp.tanh(x13[:, :e2] + b1)                                   # (B*S, E//2)
    # b2 dropped: softmax over seq is shift-invariant, a scalar score bias is a no-op.
    score = jnp.sum(a1 * w2r, axis=-1, keepdims=True)                 # (B*S, 1)

    # softmax over the seq axis (PyTorch dim=1), per batch.  B is a small static
    # constant; each S=8 segment is exactly one f32 sublane tile, so the unrolled
    # static slices / concat are tile-aligned and near-free.  (Re-vectorize if B grows.)
    segs = []
    for b in range(batch):
        sb = score[b * seq:(b + 1) * seq, :]                          # (S, 1)
        eb = jnp.exp(sb - jnp.max(sb, axis=0, keepdims=True))
        segs.append(eb / jnp.sum(eb, axis=0, keepdims=True))          # exact normalization
    attn = jnp.concatenate(segs, axis=0)                              # (B*S, 1)

    # --- network: Linear(E, H) -> ReLU -> Dropout(identity) -> Linear(H, Cpad) ---
    # Reassociated: (attn * x) @ w3 + b3  ==  attn * (x @ w3) + b3  (attn is per-row scalar).
    h = jnp.maximum(attn * x13[:, e2pad:e2pad + hdim] + b3, 0.0)      # (B*S, H)
    # TODO(synk): Dropout is a no-op at inference; training-time RNG mask not implemented.
    out_ref[...] = (
        jnp.dot(h, w4p_ref[...], preferred_element_type=jnp.float32) + b4p
    )                                                                 # (B*S, Cpad) lane-dense store


def make_params(key, emb_dim, h_dim, n_classes):
    """kaiming_normal_(fan_in, relu) weights (as in the module).  Biases are small
    random values instead of the module's zero init so the reference check actually
    exercises every bias path -- including b2, which the kernel provably drops via
    softmax shift-invariance."""
    e2 = emb_dim // 2
    ks = jax.random.split(key, 8)

    def kaiming(k, fan_in, shape):
        std = jnp.sqrt(2.0 / fan_in)  # gain=sqrt(2) for relu, mode=fan_in
        return std * jax.random.normal(k, shape, dtype=jnp.float32)

    # stored as (in_dim, out_dim), i.e. already transposed vs torch's (out, in)
    w1 = kaiming(ks[0], emb_dim, (emb_dim, e2))
    w2 = kaiming(ks[1], e2, (e2, 1))
    w3 = kaiming(ks[2], emb_dim, (emb_dim, h_dim))
    w4 = kaiming(ks[3], h_dim, (h_dim, n_classes))
    b1 = 0.1 * jax.random.normal(ks[4], (1, e2), dtype=jnp.float32)
    b2 = 0.1 * jax.random.normal(ks[5], (1, 1), dtype=jnp.float32)
    b3 = 0.1 * jax.random.normal(ks[6], (1, h_dim), dtype=jnp.float32)
    b4 = 0.1 * jax.random.normal(ks[7], (1, n_classes), dtype=jnp.float32)
    return (w1, b1, w2, b2, w3, b3, w4, b4)


def irony_classifier(x, params):
    B, S, E = x.shape
    w1, b1, w2, b2, w3, b3, w4, b4 = params
    del b2  # mathematically irrelevant under the per-sequence softmax (shift invariance)
    e2 = w1.shape[1]
    H = w3.shape[1]
    C = w4.shape[1]
    BS = B * S
    Cp = ((C + 127) // 128) * 128     # lane-dense output width (multiple of 128)
    E2P = ((e2 + 127) // 128) * 128   # pad attention half so both fused-result slices
                                      # land on vreg-aligned lane offsets (0 and E2P)
    # The single (8,128) packed-vector tile assumes these all fit in one lane group.
    assert e2 <= 128 and H <= 128 and Cp == 128, "re-pack vec tile for larger dims"

    # Free XLA-side layout plumbing (outside the kernel).
    x2d = x.astype(jnp.float32).reshape(BS, E)
    w13 = jnp.zeros((E, E2P + H), jnp.float32)        # fused [w1 (padded) | w3]
    w13 = w13.at[:, :e2].set(w1)
    w13 = w13.at[:, E2P:E2P + H].set(w3)
    w4p = jnp.pad(w4, ((0, 0), (0, Cp - C)))
    vecs = jnp.zeros((8, 128), jnp.float32)           # one tile for all 1-row operands
    vecs = vecs.at[0, :e2].set(b1[0])
    vecs = vecs.at[1, :e2].set(w2[:, 0])
    vecs = vecs.at[2, :H].set(b3[0])
    vecs = vecs.at[3, :C].set(b4[0])

    kernel = functools.partial(irony_kernel, batch=B, seq=S, e2=e2, hdim=H, e2pad=E2P)

    out = pl.pallas_call(
        kernel,
        out_shape=jax.ShapeDtypeStruct((BS, Cp), jnp.float32),
        grid=(1,),
        in_specs=[
            pl.BlockSpec((BS, E), lambda i: (0, 0)),        # x (flattened batch*seq)
            pl.BlockSpec(w13.shape, lambda i: (0, 0)),      # fused [w1 | w3]
            pl.BlockSpec(vecs.shape, lambda i: (0, 0)),     # packed b1 / w2 / b3 / b4
            pl.BlockSpec(w4p.shape, lambda i: (0, 0)),      # w4 padded to Cp classes
        ],
        out_specs=pl.BlockSpec((BS, Cp), lambda i: (0, 0)),
        compiler_params=pltpu.CompilerParams(dimension_semantics=("arbitrary",)),
    )(x2d, w13, vecs, w4p)

    # Slice padded classes off and restore the (B, S, C) shape.
    return out[:, :C].reshape(B, S, C)


def irony_classifier_ref(x, params):
    """Pure-JAX reference matching the PyTorch forward (b2 included)."""
    w1, b1, w2, b2, w3, b3, w4, b4 = params
    a1 = jnp.tanh(x @ w1 + b1)
    score = a1 @ w2 + b2                              # (B, S, 1)
    attn = jax.nn.softmax(score, axis=1)              # softmax over dim=1
    ctx = attn * x
    h = jax.nn.relu(ctx @ w3 + b3)
    return h @ w4 + b4


if __name__ == "__main__":
    B, S, E, H, C = 2, 8, 32, 32, 4   # batch, seq, emb_dim, h_dim, n_classes

    key = jax.random.PRNGKey(0)
    kx, kp = jax.random.split(key)
    x = jax.random.normal(kx, (B, S, E), dtype=jnp.float32)
    params = make_params(kp, E, H, C)

    fwd = jax.jit(irony_classifier)
    out = jax.block_until_ready(fwd(x, params))

    ref = irony_classifier_ref(x, params)
    assert out.shape == (B, S, C)
    assert jnp.allclose(out, ref, rtol=1e-3, atol=1e-3), "mismatch vs reference"

    print("KERNEL_OK")
</pallas_src>

<mosaic_0001>
module attributes {stable_mosaic.version = 11 : i64} {
  func.func @irony_kernel(%arg0: i32, %arg1: memref<16x32xf32, #tpu.memory_space<vmem>>, %arg2: memref<32x160xf32, #tpu.memory_space<vmem>>, %arg3: memref<8x128xf32, #tpu.memory_space<vmem>>, %arg4: memref<32x128xf32, #tpu.memory_space<vmem>>, %arg5: memref<16x128xf32, #tpu.memory_space<vmem>>) attributes {dimension_semantics = [#tpu.dimension_semantics<arbitrary>], iteration_bounds = array<i64: 1>, scalar_prefetch = 0 : i64, scratch_operands = 0 : i64, tpu.core_type = #tpu.core_type<tc>, window_params = [{pipeline_mode = #tpu.pipeline_mode<synchronous>, transform_indices = @transform_0, window_bounds = array<i64: 16, 32>}, {pipeline_mode = #tpu.pipeline_mode<synchronous>, transform_indices = @transform_1, window_bounds = array<i64: 32, 160>}, {pipeline_mode = #tpu.pipeline_mode<synchronous>, transform_indices = @transform_2, window_bounds = array<i64: 8, 128>}, {pipeline_mode = #tpu.pipeline_mode<synchronous>, transform_indices = @transform_3, window_bounds = array<i64: 32, 128>}, {pipeline_mode = #tpu.pipeline_mode<synchronous>, transform_indices = @transform_4, window_bounds = array<i64: 16, 128>}]} {
    %c0 = arith.constant 0 : index
    %c0_0 = arith.constant 0 : index
    %0 = vector.load %arg1[%c0, %c0_0] : memref<16x32xf32, #tpu.memory_space<vmem>>, vector<16x32xf32>
    %c0_1 = arith.constant 0 : index
    %c0_2 = arith.constant 0 : index
    %1 = vector.load %arg2[%c0_1, %c0_2] : memref<32x160xf32, #tpu.memory_space<vmem>>, vector<32x160xf32>
    %cst = arith.constant dense<0.000000e+00> : vector<16x160xf32>
    %2 = tpu.matmul %0, %1, %cst {dimension_numbers = #tpu.dot_dimension_numbers<[1], [0], [0], [1], [0, 0, 1, 1], [], []>} : vector<16x32xf32>, vector<32x160xf32>, vector<16x160xf32> -> vector<16x160xf32>
    %c0_3 = arith.constant 0 : index
    %c0_4 = arith.constant 0 : index
    %3 = vector.load %arg3[%c0_3, %c0_4] : memref<8x128xf32, #tpu.memory_space<vmem>>, vector<1x16xf32>
    %c1 = arith.constant 1 : index
    %c0_5 = arith.constant 0 : index
    %4 = vector.load %arg3[%c1, %c0_5] : memref<8x128xf32, #tpu.memory_space<vmem>>, vector<1x16xf32>
    %c2 = arith.constant 2 : index
    %c0_6 = arith.constant 0 : index
    %5 = vector.load %arg3[%c2, %c0_6] : memref<8x128xf32, #tpu.memory_space<vmem>>, vector<1x32xf32>
    %c3 = arith.constant 3 : index
    %c0_7 = arith.constant 0 : index
    %6 = vector.load %arg3[%c3, %c0_7] : memref<8x128xf32, #tpu.memory_space<vmem>>, vector<1x128xf32>
    %7 = vector.extract_strided_slice %2 {offsets = [0, 0], sizes = [16, 16], strides = [1, 1]} : vector<16x160xf32> to vector<16x16xf32>
    %8 = vector.broadcast %3 : vector<1x16xf32> to vector<16x16xf32>
    %9 = arith.addf %7, %8 : vector<16x16xf32>
    %10 = math.tanh %9 : vector<16x16xf32>
    %11 = vector.broadcast %4 : vector<1x16xf32> to vector<16x16xf32>
    %12 = arith.mulf %10, %11 : vector<16x16xf32>
    %cst_8 = arith.constant dense<0.000000e+00> : vector<16xf32>
    %13 = vector.multi_reduction <add>, %12, %cst_8 [1] : vector<16x16xf32> to vector<16xf32>
    %14 = vector.shape_cast %13 : vector<16xf32> to vector<16x1xf32>
    %15 = vector.extract_strided_slice %14 {offsets = [0, 0], sizes = [8, 1], strides = [1, 1]} : vector<16x1xf32> to vector<8x1xf32>
    %cst_9 = arith.constant dense<0xFF800000> : vector<1xf32>
    %16 = vector.multi_reduction <maximumf>, %15, %cst_9 [0] : vector<8x1xf32> to vector<1xf32>
    %17 = vector.shape_cast %16 : vector<1xf32> to vector<1x1xf32>
    %18 = vector.broadcast %17 : vector<1x1xf32> to vector<8x1xf32>
    %19 = arith.subf %15, %18 : vector<8x1xf32>
    %20 = math.exp %19 : vector<8x1xf32>
    %cst_10 = arith.constant dense<0.000000e+00> : vector<1xf32>
    %21 = vector.multi_reduction <add>, %20, %cst_10 [0] : vector<8x1xf32> to vector<1xf32>
    %22 = vector.shape_cast %21 : vector<1xf32> to vector<1x1xf32>
    %23 = vector.broadcast %22 : vector<1x1xf32> to vector<8x1xf32>
    %24 = arith.divf %20, %23 : vector<8x1xf32>
    %25 = vector.extract_strided_slice %14 {offsets = [8, 0], sizes = [8, 1], strides = [1, 1]} : vector<16x1xf32> to vector<8x1xf32>
    %cst_11 = arith.constant dense<0xFF800000> : vector<1xf32>
    %26 = vector.multi_reduction <maximumf>, %25, %cst_11 [0] : vector<8x1xf32> to vector<1xf32>
    %27 = vector.shape_cast %26 : vector<1xf32> to vector<1x1xf32>
    %28 = vector.broadcast %27 : vector<1x1xf32> to vector<8x1xf32>
    %29 = arith.subf %25, %28 : vector<8x1xf32>
    %30 = math.exp %29 : vector<8x1xf32>
    %cst_12 = arith.constant dense<0.000000e+00> : vector<1xf32>
    %31 = vector.multi_reduction <add>, %30, %cst_12 [0] : vector<8x1xf32> to vector<1xf32>
    %32 = vector.shape_cast %31 : vector<1xf32> to vector<1x1xf32>
    %33 = vector.broadcast %32 : vector<1x1xf32> to vector<8x1xf32>
    %34 = arith.divf %30, %33 : vector<8x1xf32>
    %35 = tpu.concatenate %24, %34 in 0 : vector<8x1xf32>, vector<8x1xf32> -> vector<16x1xf32>
    %36 = vector.extract_strided_slice %2 {offsets = [0, 128], sizes = [16, 32], strides = [1, 1]} : vector<16x160xf32> to vector<16x32xf32>
    %37 = vector.broadcast %35 : vector<16x1xf32> to vector<16x32xf32>
    %38 = arith.mulf %37, %36 : vector<16x32xf32>
    %39 = vector.broadcast %5 : vector<1x32xf32> to vector<16x32xf32>
    %40 = arith.addf %38, %39 : vector<16x32xf32>
    %cst_13 = arith.constant 0.000000e+00 : f32
    %41 = vector.broadcast %cst_13 : f32 to vector<16x32xf32>
    %42 = arith.maximumf %40, %41 : vector<16x32xf32>
    %c0_14 = arith.constant 0 : index
    %c0_15 = arith.constant 0 : index
    %43 = vector.load %arg4[%c0_14, %c0_15] : memref<32x128xf32, #tpu.memory_space<vmem>>, vector<32x128xf32>
    %cst_16 = arith.constant dense<0.000000e+00> : vector<16x128xf32>
    %44 = tpu.matmul %42, %43, %cst_16 {dimension_numbers = #tpu.dot_dimension_numbers<[1], [0], [0], [1], [0, 0, 1, 1], [], []>} : vector<16x32xf32>, vector<32x128xf32>, vector<16x128xf32> -> vector<16x128xf32>
    %45 = vector.broadcast %6 : vector<1x128xf32> to vector<16x128xf32>
    %46 = arith.addf %44, %45 : vector<16x128xf32>
    %c0_17 = arith.constant 0 : index
    %c0_18 = arith.constant 0 : index
    %47 = vector.load %arg5[%c0_17, %c0_18] : memref<16x128xf32, #tpu.memory_space<vmem>>, vector<16x128xf32>
    tpu.vector_store %arg5[%c0_17, %c0_18], %46 {strides = array<i32>} : memref<16x128xf32, #tpu.memory_space<vmem>>, vector<16x128xf32>,
    return
  }
  func.func @transform_0(%arg0: i32) -> (i32, i32) {
    %c0_i32 = arith.constant 0 : i32
    %c0_i32_0 = arith.constant 0 : i32
    %c0_i32_1 = arith.constant 0 : i32
    return %c0_i32, %c0_i32_0 : i32, i32
  }
  func.func @transform_1(%arg0: i32) -> (i32, i32) {
    %c0_i32 = arith.constant 0 : i32
    %c0_i32_0 = arith.constant 0 : i32
    %c0_i32_1 = arith.constant 0 : i32
    return %c0_i32, %c0_i32_0 : i32, i32
  }
  func.func @transform_2(%arg0: i32) -> (i32, i32) {
    %c0_i32 = arith.constant 0 : i32
    %c0_i32_0 = arith.constant 0 : i32
    %c0_i32_1 = arith.constant 0 : i32
    return %c0_i32, %c0_i32_0 : i32, i32
  }
  func.func @transform_3(%arg0: i32) -> (i32, i32) {
    %c0_i32 = arith.constant 0 : i32
    %c0_i32_0 = arith.constant 0 : i32
    %c0_i32_1 = arith.constant 0 : i32
    return %c0_i32, %c0_i32_0 : i32, i32
  }
  func.func @transform_4(%arg0: i32) -> (i32, i32) {
    %c0_i32 = arith.constant 0 : i32
    %c0_i32_0 = arith.constant 0 : i32
    %c0_i32_1 = arith.constant 0 : i32
    return %c0_i32, %c0_i32_0 : i32, i32
  }
}

</mosaic_0001>

<bundles_post_ra>
// kernel: irony_classifier.1
= control target key start
LH: loop header
LB: loop body
LE: loop exit
PB: predicated region body
PF: predicated region fallthrough
CT: control target
= control target key end

     0   :  { %v342_v3 = vmov 0.0   ;;  %vm27_vm0 = vcmask 261120   ;;  %vm129_vm1 = vcmask 130048   ;;  %v343_v29 = vmov 0   ;;  %s439_s1 = inlined_call_operand.vmem [shape: f32[32,160], index: 1, kind: input, shape index: {}]   ;;  %s440_s0 = inlined_call_operand.vmem [shape: f32[16,32], index: 0, kind: input, shape index: {}]   ;;  %s441_s2 = inlined_call_operand.vmem [shape: f32[8,128], index: 2, kind: input, shape index: {}]   ;;  %s442_s3 = inlined_call_operand.vmem [shape: f32[32,128], index: 3, kind: input, shape index: {}]   ;;  %s443_s4 = inlined_call_operand.vmem [shape: f32[16,128], index: 4, kind: output, shape index: {}]  }
   0x1   :  { %v20_v0 = vld [vmem:[%s439_s1 + $0x8] sm:$0xff]  ;;  %v22_v1 = vld [vmem:[%s439_s1 + $0x18] sm:$0xff]  ;;  %v19_v2 = vld [vmem:[%s439_s1] sm:$0xff]  ;;  %98 = vmatprep.mubr.f32.mxu0 %v342_v3  ;;  %328 = vset.pattern.permute.xlu1 %v343_v29 }
   0x2   :  { %v310_v4 = vpack.c.bf16 %v22_v1, %v20_v0  ;;  %v21_v5 = vld [vmem:[%s439_s1 + $0x10] sm:$0xff]  ;;  %v24_v6 = vld [vmem:[%s439_s1 + $0x28] sm:$0xff]  ;;  %v26_v7 = vld [vmem:[%s439_s1 + $0x38] sm:$0xff]  ;;  %329 = vset.pattern.permute.xlu0 %v343_v29 }
   0x3   :  { %v312_v8 = vpack.c.bf16 %v21_v5, %v19_v2  ;;  %v314_v9 = vpack.c.bf16 %v26_v7, %v24_v6  ;;  %v23_v10 = vld [vmem:[%s439_s1 + $0x20] sm:$0xff]  ;;  %v25_v11 = vld [vmem:[%s439_s1 + $0x30] sm:$0xff]  ;;  %v18_v14 = vld [vmem:[%s440_s0 + $0x8] sm:$0xff] }
   0x4   :  { %311 = vmatprep.subr.bf16.mxu0 %v310_v4  ;;  %v316_v12 = vpack.c.bf16 %v25_v11, %v23_v10  ;;  %v17_v13 = vld [vmem:[%s440_s0] sm:$0xff]  ;;  %v191_v1 = vld [vmem:[%s442_s3 + $0x8] sm:$0xff]  ;;  %v192_v5 = vld [vmem:[%s442_s3 + $0x10] sm:$0xff] }
   0x5   :  { %313 = vmatpush1.bf16.msra.mxu0 %v312_v8  ;;  %v287_v15 = vld [vmem:[%s441_s2] ss:$0 sm:$0xff]  ;;  %v288_v22 = vld [vmem:[%s441_s2 + $0x1] ss:$0 sm:$0xff]  ;;  %v193_v6 = vld [vmem:[%s442_s3 + $0x18] sm:$0xff] }
   0x6   :  { %315 = vmatprep.subr.bf16.mxu0 %v314_v9  ;;  %v190_v0 = vld [vmem:[%s442_s3] sm:$0xff]  ;;  %v322_v7 = vpack.c.bf16 %v193_v6, %v192_v5 }
   0x7   :  { %v318_v2 = vpack.c.bf16 %v191_v1, %v190_v0  ;;  %v289_v9 = vld [vmem:[%s441_s2 + $0x2] ss:$0 sm:$0xff] }
   0x9   :  { %317 = vmatpush1.bf16.msra.mxu0 %v316_v12  ;;  %319 = vmatprep.subr.bf16.mxu1 %v318_v2 }
   0xa   :  { %321 = vmatpush3.bf16.msra.mxu1 %v318_v2 }
   0xb   :  { %323 = vmatprep.subr.bf16.mxu1 %v322_v7 }
   0xc   :  { %285 = vmatmul.mubr.msk.f32.vlgmr.msra.gmra.mrb[0].mxu0 %vm27_vm0, %v17_v13 }
   0xd   :  { %104 = vmatprep.mubr.f32.mxu0 %v342_v3 }
   0xe   :  { %325 = vmatpush3.bf16.msra.mxu1 %v322_v7 }
  0x10   :  { %286 = vmatmul.mubr.msk.f32.gmra.mrb[2].mxu0 %vm27_vm0, %v18_v14 }
  0xdf   :  { %v100_v16 = vpop.f32.mrb[0].mxu0 }
  0xe0   :  { %v119_v17 = vadd.f32 %v287_v15, %v100_v16  ;;  %v404_v18 = vpop.f32.mrb[1].mxu0 }
  0xe2   :  { %330 = vtanh.f32 %v119_v17  ;;  %v290_v17 = vld [vmem:[%s441_s2 + $0x3] ss:$0 sm:$0xff] }
  0xe3   :  { %v106_v19 = vpop.f32.mrb[2].mxu0 }
  0xe4   :  { %v120_v20 = vadd.f32 %v287_v15, %v106_v19  ;;  %v406_v21 = vpop.f32.mrb[3].mxu0 }
  0xe6   :  { %332 = vtanh.f32 %v120_v20 }
  0xec   :  { %v331_v23 = vpop.eup %330 }
  0xed   :  { %v127_v24 = vmul.f32 %v331_v23, %v288_v22 }
  0xef   :  { %v130_v25 = vsel %vm129_vm1, %v127_v24, 0.0 }
  0xf0   :  { %v333_v26 = vpop.eup %332  ;;  %131 = vadd.xlane.f32.xlu0 %v130_v25 }
  0xf1   :  { %v128_v27 = vmul.f32 %v333_v26, %v288_v22 }
  0xf3   :  { %v133_v28 = vsel %vm129_vm1, %v128_v27, 0.0 }
  0xf4   :  { %134 = vadd.xlane.f32.xlu0 %v133_v28 }
 0x17d   :  { %v132_v30 = vpop.xlane.xlu0 %131 }
 0x17e   :  { %v136_v31 = vrot.slane %v132_v30, 4 }
 0x180   :  { %v137_v32 = vmax.f32 %v132_v30, %v136_v31 }
 0x181   :  { %v135_v33 = vpop.xlane.xlu0 %134 }
 0x182   :  { %v138_v34 = vrot.slane %v137_v32, 2  ;;  %v153_v35 = vrot.slane %v135_v33, 4 }
 0x184   :  { %v139_v36 = vmax.f32 %v137_v32, %v138_v34  ;;  %v154_v37 = vmax.f32 %v135_v33, %v153_v35 }
 0x186   :  { %v140_v38 = vrot.slane %v139_v36, 1  ;;  %v155_v39 = vrot.slane %v154_v37, 2 }
 0x188   :  { %v141_v40 = vmax.f32 %v139_v36, %v140_v38  ;;  %v156_v41 = vmax.f32 %v154_v37, %v155_v39 }
 0x18a   :  { %v142_v42 = vsub.f32 %v132_v30, %v141_v40  ;;  %v157_v43 = vrot.slane %v156_v41, 1 }
 0x18c   :  { %v143_v44 = vmul.f32 1.442695, %v142_v42  ;;  %v158_v45 = vmax.f32 %v156_v41, %v157_v43 }
 0x18e   :  { %334 = vpow2.f32 %v143_v44  ;;  %v159_v46 = vsub.f32 %v135_v33, %v158_v45 }
 0x190   :  { %v160_v47 = vmul.f32 1.442695, %v159_v46 }
 0x192   :  { %336 = vpow2.f32 %v160_v47 }
 0x198   :  { %v335_v48 = vpop.eup %334 }
 0x199   :  { %v145_v49 = vrot.slane %v335_v48, 4 }
 0x19b   :  { %v146_v50 = vadd.f32 %v335_v48, %v145_v49 }
 0x19c   :  { %v337_v51 = vpop.eup %336 }
 0x19d   :  { %v147_v52 = vrot.slane %v146_v50, 2  ;;  %v162_v53 = vrot.slane %v337_v51, 4 }
 0x19f   :  { %v148_v54 = vadd.f32 %v147_v52, %v146_v50  ;;  %v163_v55 = vadd.f32 %v337_v51, %v162_v53 }
 0x1a1   :  { %v149_v56 = vrot.slane %v148_v54, 1  ;;  %v164_v57 = vrot.slane %v163_v55, 2 }
 0x1a3   :  { %v150_v58 = vadd.f32 %v149_v56, %v148_v54  ;;  %v165_v59 = vadd.f32 %v164_v57, %v163_v55 }
 0x1a5   :  { %338 = vrcp.f32 %v150_v58  ;;  %v166_v60 = vrot.slane %v165_v59, 1 }
 0x1a7   :  { %v167_v61 = vadd.f32 %v166_v60, %v165_v59 }
 0x1a9   :  { %340 = vrcp.f32 %v167_v61 }
 0x1af   :  { %v339_v62 = vpop.eup %338 }
 0x1b0   :  { %v152_v63 = vmul.f32 %v339_v62, %v335_v48 }
 0x1b2   :  { %172 = vperm.xlu1 %328, %v152_v63  }
 0x1b3   :  { %v341_v3 = vpop.eup %340 }
 0x1b4   :  { %v169_v4 = vmul.f32 %v341_v3, %v337_v51 }
 0x1b6   :  { %177 = vperm.xlu1 %328, %v169_v4  }
 0x231   :  { %v173_v8 = vpop.permute.xlu1 %172 }
 0x232   :  { %v180_v10 = vmul.f32 %v173_v8, %v404_v18 }
 0x234   :  { %v186_v11 = vadd.f32 %v289_v9, %v180_v10 }
 0x235   :  { %v178_v12 = vpop.permute.xlu1 %177 }
 0x236   :  { %v181_v13 = vmul.f32 %v178_v12, %v406_v21  ;;  %v188_v14 = vmax.f32 %v186_v11, 0.0 }
 0x238   :  { %v187_v15 = vadd.f32 %v289_v9, %v181_v13  ;;  %307 = vmatprep.mubr.msk.f32.mxu1 %vm27_vm0, %v188_v14 }
 0x23a   :  { %v189_v16 = vmax.f32 %v187_v15, 0.0 }
 0x23c   :  { %308 = vmatmul.mubr.msk.f32.vlgmr.msra.gmra.mrb[0].mxu1 %vm27_vm0, %v189_v16 }
 0x30f   :  { %v309_v19 = vpop.f32.mrb[0].mxu1 }
 0x310   :  { %v276_v20 = vadd.f32 %v309_v19, %v290_v17  ;;  %v270_v22 = vpop.f32.mrb[1].mxu1 }
 0x311   :  { %v271_v23 = vadd.f32 %v290_v17, %v270_v22 }
 0x312   :  { %280 = vst [vmem:[%s443_s4 + $0x8] sm:$0xff] %v276_v20 }
 0x313   :  { %279 = vst [vmem:[%s443_s4] sm:$0xff] %v271_v23 }

</bundles_post_ra>
